<compile_context>
chip_gen: v7x
topology: tpu7x:2x2x1
jax: 0.10.0
libtpu: 0.0.40
codegen_flags: <defaults>
</compile_context>

<pallas_src>
import jax
import jax.numpy as jnp
from jax.experimental import pallas as pl
from jax.experimental.pallas import tpu as pltpu

# ---- synthetic student dimensions --------------------------------------------------
B, C_IN, H, W = 2, 4, 16, 16
C_MID = 8
NUM_CLASSES = 10
KH = KW = 3
HP, WP = H + 2, W + 2          # zero-padded spatial dims ('SAME' 3x3 conv)
K_IN = WP * C_IN               # 72  columns of a flattened padded image row
LANES = W * C_MID              # 128 lane-dense activation / output width


# ---- Pallas kernel: shift-matmul conv + bias/ReLU -> GAP -> FC, all in VMEM ---------
def _student_kernel(x_ref, wdy_ref, b1_ref, gsel_ref, psel_ref, head_ref, b2_ref,
                    logits_ref, feat_ref):
    # Conv as 3 batched shift-and-accumulate matmuls (rows are (y*B + b) ordered, so a
    # single contiguous slice per dy covers every batch).
    acc = jnp.zeros((B * H, LANES), jnp.float32)
    for dy in range(KH):                                           # static, unrolled
        rows = x_ref[pl.ds(dy * B, B * H), :]                      # (B*H, 72) bf16
        acc = acc + jnp.dot(rows, wdy_ref[dy],
                            preferred_element_type=jnp.float32)    # (B*H, 128) f32
    h = jnp.maximum(acc + b1_ref[...], 0.0)                        # bias + ReLU (VPU)

    # GAP (ones-selector matmul, 1/(H*W) folded in), channel fold, FC head — all MXU.
    pooled = jnp.dot(gsel_ref[...], h, preferred_element_type=jnp.float32)   # (B, 128)
    feat_ref[...] = jnp.dot(pooled, psel_ref[...],
                            preferred_element_type=jnp.float32)              # (B, 128)
    logits_ref[...] = jnp.dot(pooled, head_ref[...],
                              preferred_element_type=jnp.float32) + b2_ref[...]


# ---- one-time parameter preparation (torch layout -> kernel-ready slabs) ------------
def init_params(key):
    k1, k2, k3, k4 = jax.random.split(key, 4)
    w_conv = 0.1 * jax.random.normal(k1, (C_MID, C_IN, KH, KW), jnp.float32)  # OIHW
    b1 = 0.1 * jax.random.normal(k2, (C_MID,), jnp.float32)
    w2 = 0.1 * jax.random.normal(k3, (C_MID, NUM_CLASSES), jnp.float32)
    b2 = 0.1 * jax.random.normal(k4, (NUM_CLASSES,), jnp.float32)
    return w_conv, b1, w2, b2


def prepare_student_params(params):
    """Convert PyTorch-layout params into the kernel's matmul slabs (done once)."""
    w_conv, b1, w2, b2 = params
    w_k = jnp.transpose(w_conv, (2, 3, 1, 0))        # (KH, KW, C_IN, C_MID)

    # Block-Toeplitz slab per kernel row dy:
    #   wdy[dy, x_in*C_IN + c, x_out*C_MID + m] = w_k[dy, x_in - x_out, c, m]
    j = jnp.arange(K_IN)
    x_in, c = j // C_IN, j % C_IN
    k = jnp.arange(LANES)
    x_out, m = k // C_MID, k % C_MID
    dx = x_in[:, None] - x_out[None, :]
    valid = (dx >= 0) & (dx < KW)
    gathered = w_k[:, jnp.clip(dx, 0, KW - 1), c[:, None], m[None, :]]  # (KH, 72, 128)
    wdy = jnp.where(valid[None], gathered, 0.0).astype(jnp.bfloat16)

    b1row = jnp.tile(b1, W).reshape(1, LANES).astype(jnp.float32)

    # GAP selector over (y*B + b) rows, 1/(H*W) folded in:  (B, B*H)
    b_of_row = jnp.arange(B * H) % B
    gsel = (jnp.arange(B)[:, None] == b_of_row[None, :]).astype(jnp.float32) / (H * W)

    # pooling fold: [x*C_MID+m, m'] = 1 if m == m' (collapses lanes -> channel mean)
    pselp = (m[:, None] == jnp.arange(LANES)[None, :]).astype(jnp.float32)   # (128,128)

    # FC head padded to 128x128, pre-folded with the pooling selector
    w2p = jnp.zeros((LANES, LANES), jnp.float32).at[:C_MID, :NUM_CLASSES].set(w2)
    head = pselp @ w2p                                                       # (128,128)
    b2p = jnp.zeros((1, LANES), jnp.float32).at[0, :NUM_CLASSES].set(b2)
    return wdy, b1row, gsel, pselp, head, b2p


# ---- student forward: minimal glue (transpose+pad+reshape fuse) + one pallas_call ---
@jax.jit
def student_forward(image_nchw, kparams):
    wdy, b1row, gsel, pselp, head, b2p = kparams
    x = jnp.transpose(image_nchw, (0, 2, 3, 1)).astype(jnp.float32)    # NHWC
    x = jnp.pad(x, ((0, 0), (1, 1), (1, 1), (0, 0)))                   # 'SAME' pad
    # rows = (y_pad * B + b), cols = (x_pad * C_IN + c); batch-innermost so each dy
    # shift is one contiguous slice; bf16 halves the input DMA.
    xrow = jnp.transpose(x, (1, 0, 2, 3)).reshape(HP * B, K_IN).astype(jnp.bfloat16)

    flops = (2 * KH * (B * H) * K_IN * LANES      # conv shift matmuls
             + 2 * B * (B * H) * LANES            # GAP selector matmul
             + 2 * 2 * B * LANES * LANES)         # pooling fold + FC head
    bytes_accessed = (xrow.size * 2 + wdy.size * 2 + b1row.size * 4 + gsel.size * 4
                      + pselp.size * 4 + head.size * 4 + b2p.size * 4
                      + 2 * B * LANES * 4)

    vmem = pl.BlockSpec(memory_space=pltpu.MemorySpace.VMEM)
    logits_pad, feat_pad = pl.pallas_call(
        _student_kernel,
        out_shape=(jax.ShapeDtypeStruct((B, LANES), jnp.float32),
                   jax.ShapeDtypeStruct((B, LANES), jnp.float32)),
        in_specs=[vmem] * 7,
        out_specs=(vmem, vmem),
        cost_estimate=pl.CostEstimate(flops=flops, transcendentals=0,
                                      bytes_accessed=bytes_accessed),
    )(xrow, wdy, b1row, gsel, pselp, head, b2p)
    # TODO(synk): if B is ever scaled up, add a parallel batch grid axis
    # (dimension_semantics=("parallel",)) so v7x's two TensorCores split the work.
    return logits_pad[:, :NUM_CLASSES], feat_pad[:, :C_MID]


# ---- JAX port of the Distiller base class ------------------------------------------
class Distiller:
    def __init__(self, student, teacher):
        self.student = student
        self.teacher = teacher
        self.training = False          # teacher is always eval; default eval mode

    def train(self, mode=True):
        if not isinstance(mode, bool):
            raise ValueError("training mode is expected to be boolean")
        self.training = mode
        return self

    def eval(self):
        return self.train(False)

    def get_learnable_parameters(self):
        return []                      # synthetic params held externally

    def get_extra_parameters(self):
        return 0

    def forward_train(self, **kwargs):
        # TODO(synk): distillation losses are abstract in the base class.
        raise NotImplementedError()

    def forward_test(self, image):
        return self.student(image)[0]

    def __call__(self, **kwargs):      # == nn.Module.forward
        if self.training:
            return self.forward_train(**kwargs)
        return self.forward_test(kwargs["image"])


if __name__ == "__main__":
    root = jax.random.PRNGKey(0)
    k_img, k_param = jax.random.split(root)
    image = jax.random.normal(k_img, (B, C_IN, H, W), jnp.float32)     # NCHW input

    params = init_params(k_param)
    kparams = prepare_student_params(params)

    student = lambda img: student_forward(img, kparams)
    teacher = student                  # teacher only needs eval(); reuse
    distiller = Distiller(student, teacher).train(False)

    logits = distiller(image=image)
    logits = jax.block_until_ready(logits)

    # pure-JAX reference for the synthetic student (correctness check)
    w_conv, b1, w2, b2 = params
    ref_h = jax.lax.conv_general_dilated(
        image, w_conv, (1, 1), "SAME",
        dimension_numbers=("NCHW", "OIHW", "NCHW"))
    ref_h = jnp.maximum(ref_h + b1.reshape(1, C_MID, 1, 1), 0.0)
    ref_pooled = jnp.mean(ref_h, axis=(2, 3))
    ref_logits = ref_pooled @ w2 + b2

    _, feats = student(image)
    assert logits.shape == (B, NUM_CLASSES)
    # bf16 MXU conv inputs (f32 accumulation) -> loosened tolerance vs f32 reference
    assert jnp.allclose(logits, ref_logits, atol=1e-2, rtol=1e-2)
    assert jnp.allclose(feats, ref_pooled, atol=1e-2, rtol=1e-2)
    print("KERNEL_OK")
</pallas_src>

<mosaic_0001>
module attributes {stable_mosaic.version = 11 : i64} {
  func.func @_student_kernel(%arg0: memref<36x72xbf16, #tpu.memory_space<vmem>>, %arg1: memref<3x72x128xbf16, #tpu.memory_space<vmem>>, %arg2: memref<1x128xf32, #tpu.memory_space<vmem>>, %arg3: memref<2x32xf32, #tpu.memory_space<vmem>>, %arg4: memref<128x128xf32, #tpu.memory_space<vmem>>, %arg5: memref<128x128xf32, #tpu.memory_space<vmem>>, %arg6: memref<1x128xf32, #tpu.memory_space<vmem>>, %arg7: memref<2x128xf32, #tpu.memory_space<vmem>>, %arg8: memref<2x128xf32, #tpu.memory_space<vmem>>) attributes {dimension_semantics = [], scalar_prefetch = 0 : i64, scratch_operands = 0 : i64, tpu.core_type = #tpu.core_type<tc>} {
    %cst = arith.constant 0.000000e+00 : f32
    %0 = vector.broadcast %cst : f32 to vector<32x128xf32>
    %c0 = arith.constant 0 : index
    %c0_0 = arith.constant 0 : index
    %1 = vector.load %arg0[%c0, %c0_0] : memref<36x72xbf16, #tpu.memory_space<vmem>>, vector<32x72xbf16>
    %c0_1 = arith.constant 0 : index
    %c0_2 = arith.constant 0 : index
    %c0_3 = arith.constant 0 : index
    %2 = vector.load %arg1[%c0_1, %c0_2, %c0_3] : memref<3x72x128xbf16, #tpu.memory_space<vmem>>, vector<1x72x128xbf16>
    %3 = vector.shape_cast %2 : vector<1x72x128xbf16> to vector<72x128xbf16>
    %cst_4 = arith.constant dense<0.000000e+00> : vector<32x128xf32>
    %4 = tpu.matmul %1, %3, %cst_4 {dimension_numbers = #tpu.dot_dimension_numbers<[1], [0], [0], [1], [0, 0, 1, 1], [], []>} : vector<32x72xbf16>, vector<72x128xbf16>, vector<32x128xf32> -> vector<32x128xf32>
    %5 = arith.addf %0, %4 : vector<32x128xf32>
    %c2 = arith.constant 2 : index
    %c0_5 = arith.constant 0 : index
    %6 = vector.load %arg0[%c2, %c0_5] : memref<36x72xbf16, #tpu.memory_space<vmem>>, vector<32x72xbf16>
    %c1 = arith.constant 1 : index
    %c0_6 = arith.constant 0 : index
    %c0_7 = arith.constant 0 : index
    %7 = vector.load %arg1[%c1, %c0_6, %c0_7] : memref<3x72x128xbf16, #tpu.memory_space<vmem>>, vector<1x72x128xbf16>
    %8 = vector.shape_cast %7 : vector<1x72x128xbf16> to vector<72x128xbf16>
    %cst_8 = arith.constant dense<0.000000e+00> : vector<32x128xf32>
    %9 = tpu.matmul %6, %8, %cst_8 {dimension_numbers = #tpu.dot_dimension_numbers<[1], [0], [0], [1], [0, 0, 1, 1], [], []>} : vector<32x72xbf16>, vector<72x128xbf16>, vector<32x128xf32> -> vector<32x128xf32>
    %10 = arith.addf %5, %9 : vector<32x128xf32>
    %c4 = arith.constant 4 : index
    %c0_9 = arith.constant 0 : index
    %11 = vector.load %arg0[%c4, %c0_9] : memref<36x72xbf16, #tpu.memory_space<vmem>>, vector<32x72xbf16>
    %c2_10 = arith.constant 2 : index
    %c0_11 = arith.constant 0 : index
    %c0_12 = arith.constant 0 : index
    %12 = vector.load %arg1[%c2_10, %c0_11, %c0_12] : memref<3x72x128xbf16, #tpu.memory_space<vmem>>, vector<1x72x128xbf16>
    %13 = vector.shape_cast %12 : vector<1x72x128xbf16> to vector<72x128xbf16>
    %cst_13 = arith.constant dense<0.000000e+00> : vector<32x128xf32>
    %14 = tpu.matmul %11, %13, %cst_13 {dimension_numbers = #tpu.dot_dimension_numbers<[1], [0], [0], [1], [0, 0, 1, 1], [], []>} : vector<32x72xbf16>, vector<72x128xbf16>, vector<32x128xf32> -> vector<32x128xf32>
    %15 = arith.addf %10, %14 : vector<32x128xf32>
    %c0_14 = arith.constant 0 : index
    %c0_15 = arith.constant 0 : index
    %16 = vector.load %arg2[%c0_14, %c0_15] : memref<1x128xf32, #tpu.memory_space<vmem>>, vector<1x128xf32>
    %17 = vector.broadcast %16 : vector<1x128xf32> to vector<32x128xf32>
    %18 = arith.addf %15, %17 : vector<32x128xf32>
    %cst_16 = arith.constant 0.000000e+00 : f32
    %19 = vector.broadcast %cst_16 : f32 to vector<32x128xf32>
    %20 = arith.maximumf %18, %19 : vector<32x128xf32>
    %c0_17 = arith.constant 0 : index
    %c0_18 = arith.constant 0 : index
    %21 = vector.load %arg3[%c0_17, %c0_18] : memref<2x32xf32, #tpu.memory_space<vmem>>, vector<2x32xf32>
    %cst_19 = arith.constant dense<0.000000e+00> : vector<2x128xf32>
    %22 = tpu.matmul %21, %20, %cst_19 {dimension_numbers = #tpu.dot_dimension_numbers<[1], [0], [0], [1], [0, 0, 1, 1], [], []>} : vector<2x32xf32>, vector<32x128xf32>, vector<2x128xf32> -> vector<2x128xf32>
    %c0_20 = arith.constant 0 : index
    %c0_21 = arith.constant 0 : index
    %23 = vector.load %arg4[%c0_20, %c0_21] : memref<128x128xf32, #tpu.memory_space<vmem>>, vector<128x128xf32>
    %cst_22 = arith.constant dense<0.000000e+00> : vector<2x128xf32>
    %24 = tpu.matmul %22, %23, %cst_22 {dimension_numbers = #tpu.dot_dimension_numbers<[1], [0], [0], [1], [0, 0, 1, 1], [], []>} : vector<2x128xf32>, vector<128x128xf32>, vector<2x128xf32> -> vector<2x128xf32>
    %c0_23 = arith.constant 0 : index
    %c0_24 = arith.constant 0 : index
    %25 = vector.load %arg8[%c0_23, %c0_24] : memref<2x128xf32, #tpu.memory_space<vmem>>, vector<2x128xf32>
    tpu.vector_store %arg8[%c0_23, %c0_24], %24 {strides = array<i32>} : memref<2x128xf32, #tpu.memory_space<vmem>>, vector<2x128xf32>,
    %c0_25 = arith.constant 0 : index
    %c0_26 = arith.constant 0 : index
    %26 = vector.load %arg5[%c0_25, %c0_26] : memref<128x128xf32, #tpu.memory_space<vmem>>, vector<128x128xf32>
    %cst_27 = arith.constant dense<0.000000e+00> : vector<2x128xf32>
    %27 = tpu.matmul %22, %26, %cst_27 {dimension_numbers = #tpu.dot_dimension_numbers<[1], [0], [0], [1], [0, 0, 1, 1], [], []>} : vector<2x128xf32>, vector<128x128xf32>, vector<2x128xf32> -> vector<2x128xf32>
    %c0_28 = arith.constant 0 : index
    %c0_29 = arith.constant 0 : index
    %28 = vector.load %arg6[%c0_28, %c0_29] : memref<1x128xf32, #tpu.memory_space<vmem>>, vector<1x128xf32>
    %29 = vector.broadcast %28 : vector<1x128xf32> to vector<2x128xf32>
    %30 = arith.addf %27, %29 : vector<2x128xf32>
    %c0_30 = arith.constant 0 : index
    %c0_31 = arith.constant 0 : index
    %31 = vector.load %arg7[%c0_30, %c0_31] : memref<2x128xf32, #tpu.memory_space<vmem>>, vector<2x128xf32>
    tpu.vector_store %arg7[%c0_30, %c0_31], %30 {strides = array<i32>} : memref<2x128xf32, #tpu.memory_space<vmem>>, vector<2x128xf32>,
    return
  }
}

</mosaic_0001>

<bundles_post_ra>
// kernel: student_forward.1
= control target key start
LH: loop header
LB: loop body
LE: loop exit
PB: predicated region body
PF: predicated region fallthrough
CT: control target
= control target key end

     0   :  { %14 = vsyncpa [#allocation3], 0  ;;  %vm69_vm0 = vcmask 1046528   ;;  %vm102_vm1 = vcmask 588800   ;;  %vm109_vm2 = vcmask 1043456   ;;  %s1322_s0 = inlined_call_operand.vmem [shape: bf16[36,72], index: 0, kind: input, shape index: {}]   ;;  %s1323_s1 = inlined_call_operand.vmem [shape: bf16[3,72,128], index: 1, kind: input, shape index: {}]   ;;  %s1324_s2 = inlined_call_operand.vmem [shape: f32[1,128], index: 2, kind: input, shape index: {}]   ;;  %s1325_s3 = inlined_call_operand.vmem [shape: f32[2,32], index: 3, kind: input, shape index: {}]   ;;  %s1326_s4 = inlined_call_operand.vmem [shape: f32[128,128], index: 4, kind: input, shape index: {}]   ;;  %s1327_s5 = inlined_call_operand.vmem [shape: f32[128,128], index: 5, kind: input, shape index: {}]   ;;  %s1328_s6 = inlined_call_operand.vmem [shape: f32[1,128], index: 6, kind: input, shape index: {}]   ;;  %s1329_s7 = inlined_call_operand.hbm [shape: f32[2,128], index: 7, kind: output, shape index: {0}]   ;;  %s1330_s8 = inlined_call_operand.hbm [shape: f32[2,128], index: 8, kind: output, shape index: {1}]  }
   0x1   :  { %v963_v0 = vld [vmem:[%s1323_s1 + $0x24] sm:$0xff]   ;;  %v964_v1 = vld [vmem:[%s1323_s1 + $0x2c] sm:$0xff]   ;;  %v965_v2 = vld [vmem:[%s1323_s1 + $0x34] sm:$0xff]  }
   0x2   :  { %770 = vmatprep.subr.bf16.mxu0 %v963_v0  ;;  %v32_v3 = vld [vmem:[%s1322_s0 + $0x4] sm:$0xf]  ;;  %v44_v4 = vld [vmem:[%s1322_s0] sm:$0xe]  ;;  %v1100_v6 = vld [vmem:[%s1322_s0 + $0x8] sm:$0xff]  }
   0x3   :  { %771 = vmatpush3.bf16.msra.mxu0 %v963_v0  ;;  %v671_v5 = vcombine.low %v44_v4, %v32_v3  ;;  %v966_v7 = vld [vmem:[%s1323_s1 + $0x3c] sm:$0xff]   ;;  %v71_v9 = vrot.slane %v1100_v6, 1  ;;  %v971_v11 = vld [vmem:[%s1322_s0 + $0x10] ss:$0 sps:$4 sm:$0x11]  }
   0x4   :  { %772 = vmatprep.subr.bf16.mxu0 %v964_v1  ;;  %v967_v12 = vld [vmem:[%s1323_s1 + $0x44] ss:$0 sps:$4 sm:$0xff]   ;;  %v73_v13 = vrot.slane %v971_v11, 1  ;;  %v31_v16 = vld [vmem:[%s1322_s0] sm:$0xf] }
   0x5   :  { %v70_v8 = vrot.slane %v671_v5, 1  ;;  %v111_v14 = vsel %vm109_vm2, %v967_v12, 0  ;;  %v970_v15 = vld [vmem:[%s1323_s1] sm:$0xff]  }
   0x7   :  { %773 = vmatpush3.bf16.msra.mxu0 %v964_v1  ;;  %v72_v10 = vsel %vm69_vm0, %v70_v8, %v71_v9 }
   0x8   :  { %774 = vmatprep.subr.bf16.mxu0 %v965_v2  ;;  %780 = vmatprep.mubr.msk.bf16.mxu0 %vm102_vm1, %v72_v10 }
   0xb   :  { %775 = vmatpush3.bf16.msra.mxu0 %v965_v2 }
   0xc   :  { %776 = vmatprep.subr.bf16.mxu0 %v966_v7 }
   0xf   :  { %777 = vmatpush3.bf16.msra.mxu0 %v966_v7 }
  0x10   :  { %955 = vmatprep.subr.msk.bf16.mxu0 %vm109_vm2, %v967_v12 }
  0x11   :  { %15 = vsyncpa [#allocation5], 0  ;;  %v74_v17 = vsel %vm69_vm0, %v71_v9, %v73_v13  ;;  %v681_v18 = vcombine.low %v31_v16, %v32_v3  ;;  %v972_v19 = vld [vmem:[%s1323_s1 + $0x8] sm:$0xff]   ;;  %v973_v20 = vld [vmem:[%s1323_s1 + $0x10] sm:$0xff]   ;;  %v270_v28 = vrot.slane %v1100_v6, 2  ;;  %vm268_vm3 = vcmask 1045504  }
  0x12   :  { %v974_v21 = vld [vmem:[%s1323_s1 + $0x18] sm:$0xff]   ;;  %v250_v22 = vld [vmem:[%s1322_s0] sm:$0xc]  ;;  %v975_v23 = vld [vmem:[%s1323_s1 + $0x20] ss:$0 sps:$4 sm:$0xff]   ;;  %v1032_v38 = vmov 0.0|0.0  }
  0x13   :  { %779 = vmatpush3.bf16.msra.mxu0 %v111_v14  ;;  %v698_v24 = vcombine.low %v250_v22, %v32_v3  ;;  %v199_v25 = vsel %vm109_vm2, %v975_v23, 0  ;;  %v977_v26 = vld [vmem:[%s1323_s1 + $0x48] sm:$0xff]   ;;  %v978_v29 = vld [vmem:[%s1323_s1 + $0x50] sm:$0xff]   ;;  %v979_v31 = vld [vmem:[%s1323_s1 + $0x58] sm:$0xff]   ;;  %899 = vmatprep.subr.bf16.mxu1 %v1032_v38  ;;  %vm1033_vm4 = vmmov 0   ;;  %v1034_v39 = vmov 0.0  }
  0x14   :  { %784 = vmatprep.subr.bf16.mxu0 %v970_v15  ;;  %v980_v32 = vld [vmem:[%s1323_s1 + $0x60] sm:$0xff]   ;;  %v983_v33 = vld [vmem:[%s1322_s0 + $0x10] ss:$0 sps:$4 sm:$0x33]   ;;  %v981_v34 = vld [vmem:[%s1323_s1 + $0x68] ss:$0 sps:$4 sm:$0xff]   ;;  %855 = vmatprep.mubr.msk.f32.mxu1 %vm1033_vm4, %v1034_v39 }
  0x15   :  { %v269_v27 = vrot.slane %v698_v24, 2  ;;  %v272_v35 = vrot.slane %v983_v33, 2  ;;  %v308_v36 = vsel %vm109_vm2, %v981_v34, 0  ;;  %v453_v40 = vld [vmem:[%s1326_s4] sm:$0xff]  ;;  %v454_v41 = vld [vmem:[%s1326_s4 + $0x8] sm:$0xff]  ;;  %v455_v42 = vld [vmem:[%s1326_s4 + $0x10] sm:$0xff] }
  0x16   :  { %781 = vmatmul.mubr.msk.bf16.vlgmr.msra.gmra.mrb[0].mxu0 %vm102_vm1, %v74_v17  ;;  %v900_v43 = vpack.c.bf16 %v454_v41, %v453_v40  ;;  %v456_v44 = vld [vmem:[%s1326_s4 + $0x18] sm:$0xff]  ;;  %v457_v46 = vld [vmem:[%s1326_s4 + $0x20] sm:$0xff]  ;;  %v458_v47 = vld [vmem:[%s1326_s4 + $0x28] sm:$0xff]  ;;  %vm379_vm5 = vcmask 261120   ;;  %s1035_s18 = smov [#allocation4]  }
  0x17   :  { %785 = vmatpush3.bf16.msra.mxu0 %v970_v15  ;;  %794 = vmatprep.mubr.msk.bf16.mxu0 %vm102_vm1, %v681_v18  ;;  %v271_v30 = vsel %vm268_vm3, %v269_v27, %v270_v28  ;;  %v273_v37 = vsel %vm268_vm3, %v270_v28, %v272_v35  ;;  %v903_v45 = vpack.c.bf16 %v456_v44, %v455_v42  ;;  %v459_v49 = vld [vmem:[%s1326_s4 + $0x30] sm:$0xff]  ;;  %v460_v50 = vld [vmem:[%s1326_s4 + $0x38] sm:$0xff]  ;;  %v461_v52 = vld [vmem:[%s1326_s4 + $0x40] sm:$0xff]  ;;  %s650_s19 = sshll.u32 %s1035_s18, 4  ;;  %s651_s19 = int_to_ptr.vmem [resolvable:$true] %s650_s19 }
  0x18   :  { %786 = vmatprep.subr.bf16.mxu0 %v972_v19  ;;  %901 = vmatpush3.bf16.msra.mxu1 %v900_v43  ;;  %v906_v48 = vpack.c.bf16 %v458_v47, %v457_v46  ;;  %v909_v51 = vpack.c.bf16 %v460_v50, %v459_v49  ;;  %v462_v53 = vld [vmem:[%s1326_s4 + $0x48] sm:$0xff]  ;;  %v463_v55 = vld [vmem:[%s1326_s4 + $0x50] sm:$0xff]  ;;  %v464_v56 = vld [vmem:[%s1326_s4 + $0x58] sm:$0xff]  ;;  %s984_s20 = scalar_lea.vmem %s651_s19, 32  ;;  %p989_p1 = scmp.lt.s32.totalorder %s651_s19, %s651_s19 }
  0x19   :  { %902 = vmatprep.subr.bf16.mxu1 %v1032_v38  ;;  %v912_v54 = vpack.c.bf16 %v462_v53, %v461_v52  ;;  %v915_v57 = vpack.c.bf16 %v464_v56, %v463_v55  ;;  %v465_v58 = vld [vmem:[%s1326_s4 + $0x60] sm:$0xff]  ;;  %v466_v59 = vld [vmem:[%s1326_s4 + $0x68] sm:$0xff]  ;;  %v467_v61 = vld [vmem:[%s1326_s4 + $0x70] sm:$0xff]  ;;  %p985_p0 = scmp.ne.s32.totalorder %s651_s19, %s984_s20  ;;  %p990_p2 = scmp.lt.s32.totalorder %s984_s20, %s984_s20 }
  0x1a   :  { %v918_v60 = vpack.c.bf16 %v466_v59, %v465_v58  ;;  %v468_v62 = vld [vmem:[%s1326_s4 + $0x78] sm:$0xff]  ;;  %v707_v0 = vld [vmem:[%s1324_s2] ss:$0 sm:$0xff]  ;;  %v541_v17 = vld [vmem:[%s1327_s5 + $0x8] sm:$0xff] }
  0x1b   :  { %787 = vmatpush3.bf16.msra.mxu0 %v972_v19  ;;  %v921_v63 = vpack.c.bf16 %v468_v62, %v467_v61  ;;  %v378_v15 = vld [vmem:[%s1325_s3] sm:$0x3]  ;;  %v542_v19 = vld [vmem:[%s1327_s5 + $0x10] sm:$0xff]  ;;  %v547_v28 = vld [vmem:[%s1327_s5 + $0x38] sm:$0xff]  ;;  %p991_p3 = por %p990_p2, %p989_p1 }
  0x1c   :  { %788 = vmatprep.subr.bf16.mxu0 %v973_v20  ;;  %904 = vmatpush3.bf16.msra.mxu1 %v903_v45  ;;  %v540_v16 = vld [vmem:[%s1327_s5] sm:$0xff]  ;;  %v546_v27 = vld [vmem:[%s1327_s5 + $0x30] sm:$0xff]  ;;  %v555_v41 = vld [vmem:[%s1327_s5 + $0x78] sm:$0xff] }
  0x1d   :  { %905 = vmatprep.subr.bf16.mxu1 %v1032_v38  ;;  %v924_v18 = vpack.c.bf16 %v541_v17, %v540_v16  ;;  %v544_v24 = vld [vmem:[%s1327_s5 + $0x20] sm:$0xff]  ;;  %v550_v33 = vld [vmem:[%s1327_s5 + $0x50] sm:$0xff]  ;;  %p992_p4 = pnand %p991_p3, %p985_p0 }
  0x1e   :  { %v554_v40 = vld [vmem:[%s1327_s5 + $0x70] sm:$0xff] }
  0x1f   :  { %789 = vmatpush3.bf16.msra.mxu0 %v973_v20  ;;  %v543_v20 = vld [vmem:[%s1327_s5 + $0x18] sm:$0xff]  ;;  %v945_v42 = vpack.c.bf16 %v555_v41, %v554_v40 }
  0x20   :  { %790 = vmatprep.subr.bf16.mxu0 %v974_v21  ;;  %907 = vmatpush3.bf16.msra.mxu1 %v906_v48 }
  0x21   :  { %908 = vmatprep.subr.bf16.mxu1 %v1032_v38 }
  0x23   :  { %791 = vmatpush3.bf16.msra.mxu0 %v974_v21 }
  0x24   :  { %956 = vmatprep.subr.msk.bf16.mxu0 %vm109_vm2, %v975_v23  ;;  %910 = vmatpush3.bf16.msra.mxu1 %v909_v51  ;;  %v927_v23 = vpack.c.bf16 %v543_v20, %v542_v19 }
  0x25   :  { %911 = vmatprep.subr.bf16.mxu1 %v1032_v38 }
  0x27   :  { %793 = vmatpush3.bf16.msra.mxu0 %v199_v25  ;;  %v545_v25 = vld [vmem:[%s1327_s5 + $0x28] sm:$0xff] }
  0x28   :  { %798 = vmatprep.subr.bf16.mxu0 %v977_v26  ;;  %913 = vmatpush3.bf16.msra.mxu1 %v912_v54 }
  0x29   :  { %914 = vmatprep.subr.bf16.mxu1 %v1032_v38 }
  0x2a   :  { %795 = vmatmul.mubr.msk.bf16.vlgmr.msra.gmra.mrb[0].mxu0 %vm102_vm1, %v1100_v6 }
  0x2b   :  { %799 = vmatpush3.bf16.msra.mxu0 %v977_v26  ;;  %808 = vmatprep.mubr.msk.bf16.mxu0 %vm102_vm1, %v271_v30  ;;  %v930_v26 = vpack.c.bf16 %v545_v25, %v544_v24  ;;  %v548_v30 = vld [vmem:[%s1327_s5 + $0x40] sm:$0xff] }
  0x2c   :  { %800 = vmatprep.subr.bf16.mxu0 %v978_v29  ;;  %916 = vmatpush3.bf16.msra.mxu1 %v915_v57 }
  0x2d   :  { %917 = vmatprep.subr.bf16.mxu1 %v1032_v38 }
  0x2f   :  { %801 = vmatpush3.bf16.msra.mxu0 %v978_v29  ;;  %v933_v29 = vpack.c.bf16 %v547_v28, %v546_v27 }
  0x30   :  { %802 = vmatprep.subr.bf16.mxu0 %v979_v31  ;;  %919 = vmatpush3.bf16.msra.mxu1 %v918_v60 }
  0x31   :  { %920 = vmatprep.subr.bf16.mxu1 %v1032_v38 }
  0x33   :  { %803 = vmatpush3.bf16.msra.mxu0 %v979_v31  ;;  %v549_v31 = vld [vmem:[%s1327_s5 + $0x48] sm:$0xff] }
  0x34   :  { %804 = vmatprep.subr.bf16.mxu0 %v980_v32  ;;  %922 = vmatpush3.bf16.msra.mxu1 %v921_v63 }
  0x35   :  { %923 = vmatprep.subr.bf16.mxu1 %v1032_v38 }
  0x37   :  { %805 = vmatpush3.bf16.msra.mxu0 %v980_v32  ;;  %v936_v32 = vpack.c.bf16 %v549_v31, %v548_v30 }
  0x38   :  { %957 = vmatprep.subr.msk.bf16.mxu0 %vm109_vm2, %v981_v34  ;;  %v551_v34 = vld [vmem:[%s1327_s5 + $0x58] sm:$0xff] }
  0x39   :  { %v939_v35 = vpack.c.bf16 %v551_v34, %v550_v33 }
  0x3b   :  { %807 = vmatpush3.bf16.msra.mxu0 %v308_v36  ;;  %v552_v36 = vld [vmem:[%s1327_s5 + $0x60] sm:$0xff] }
  0x3c   :  { %893 = vmatprep.subr.bf16.mxu0 %v1032_v38 }
  0x3e   :  { %809 = vmatmul.mubr.msk.bf16.vlgmr.msra.gmra.mrb[0].mxu0 %vm102_vm1, %v273_v37  ;;  %v553_v37 = vld [vmem:[%s1327_s5 + $0x68] sm:$0xff] }
  0x3f   :  { %820 = vmatprep.mubr.msk.f32.mxu0 %vm1033_vm4, %v1034_v39 }
 0x111   :  { %v810_v1 = vpop.f32.mrb[0].mxu0 }
 0x112   :  { %v372_v2 = vadd.f32 %v810_v1, %v707_v0  ;;  %v344_v3 = vpop.f32.mrb[1].mxu0 }
 0x113   :  { %v370_v4 = vadd.f32 %v707_v0, %v344_v3  ;;  %v811_v5 = vpop.f32.mrb[2].mxu0 }
 0x114   :  { %v373_v6 = vadd.f32 %v811_v5, %v707_v0  ;;  %v347_v7 = vpop.f32.mrb[3].mxu0  ;;  %v376_v9 = vmax.f32 %v372_v2, 0.0 }
 0x115   :  { %v371_v8 = vadd.f32 %v707_v0, %v347_v7  ;;  %v374_v11 = vmax.f32 %v370_v4, 0.0 }
 0x116   :  { %v377_v10 = vmax.f32 %v373_v6, 0.0 }
 0x117   :  { %v375_v12 = vmax.f32 %v371_v8, 0.0 }
 0x118   :  { %v897_v13 = vpack.c.bf16 %v377_v10, %v376_v9 }
 0x119   :  { %v894_v14 = vpack.c.bf16 %v375_v12, %v374_v11 }
 0x11b   :  { %895 = vmatpush3.bf16.msra.mxu0 %v894_v14 }
 0x11c   :  { %896 = vmatprep.subr.bf16.mxu0 %v1032_v38 }
 0x11f   :  { %898 = vmatpush3.bf16.msra.mxu0 %v897_v13 }
 0x122   :  { %821 = vmatmul.mubr.msk.f32.vlgmr.msra.gmra.mrb[4].mxu0 %vm379_vm5, %v378_v15 }
 0x1f5   :  { %v449_v21 = vpop.f32.mrb[4].mxu0 }
 0x1f6   :  { %v822_v22 = vpop.f32.mrb[5].mxu0  ;;  %856 = vmatmul.mubr.f32.vlgmr.msra.gmra.mrb[0].mxu1 %v449_v21 }
 0x1f7   :  { %925 = vmatpush3.bf16.msra.mxu1 %v924_v18  ;;  %890 = vmatprep.mubr.msk.f32.mxu1 %vm1033_vm4, %v1034_v39  ;;  %v942_v39 = vpack.c.bf16 %v553_v37, %v552_v36 }
 0x1f8   :  { %926 = vmatprep.subr.bf16.mxu1 %v1032_v38 }
 0x1fb   :  { %928 = vmatpush3.bf16.msra.mxu1 %v927_v23 }
 0x1fc   :  { %929 = vmatprep.subr.bf16.mxu1 %v1032_v38 }
 0x1ff   :  { %931 = vmatpush3.bf16.msra.mxu1 %v930_v26 }
 0x200   :  { %932 = vmatprep.subr.bf16.mxu1 %v1032_v38 }
 0x203   :  { %934 = vmatpush3.bf16.msra.mxu1 %v933_v29 }
 0x204   :  { %935 = vmatprep.subr.bf16.mxu1 %v1032_v38 }
 0x207   :  { %937 = vmatpush3.bf16.msra.mxu1 %v936_v32 }
 0x208   :  { %938 = vmatprep.subr.bf16.mxu1 %v1032_v38 }
 0x20b   :  { %940 = vmatpush3.bf16.msra.mxu1 %v939_v35 }
 0x20c   :  { %941 = vmatprep.subr.bf16.mxu1 %v1032_v38 }
 0x20f   :  { %943 = vmatpush3.bf16.msra.mxu1 %v942_v39 }
 0x210   :  { %944 = vmatprep.subr.bf16.mxu1 %v1032_v38 }
 0x213   :  { %946 = vmatpush3.bf16.msra.mxu1 %v945_v42 }
 0x216   :  { %891 = vmatmul.mubr.f32.vlgmr.msra.gmra.mrb[2].mxu1 %v449_v21 }
 0x2c9   :  { %v535_v43 = vpop.f32.mrb[0].mxu1 }
 0x2ca   :  { %539 = vst [vmem:[#allocation4] sm:$0x3] %v535_v43  ;;  %v857_v44 = vpop.f32.mrb[1].mxu1 }
 0x2cb   :  { %995 = shalt.err (!%p992_p4)
}
 0x2cc   :  { %s996_s21 = scalar_lea.hbm %s1330_s8, 32 }
 0x2cd   :  { %p997_p5 = scmp.ne.s32.totalorder %s1330_s8, %s996_s21  ;;  %p1000_p6 = scmp.lt.u32.totalorder %s996_s21, %s1330_s8 }
 0x2cf   :  { %p1002_p7 = pnand %p1000_p6, %p997_p5 }
 0x2d1   :  { %1005 = shalt.err (!%p1002_p7)
}
 0x2d2   :  { %653 = dma.vmem_to_hbm [thread:$0]  %s651_s19, 32, %s1330_s8, [#allocation5]   ;;  %v709_v38 = vld [vmem:[%s1328_s6] ss:$0 sm:$0xff] }
 0x2d3   :  { %s1036_s28 = smov [#allocation2]  }
 0x2d4   :  { %s640_s29 = sshll.u32 %s1036_s28, 4  ;;  %s641_s29 = int_to_ptr.vmem [resolvable:$true] %s640_s29 }
 0x2d5   :  { %s1006_s30 = scalar_lea.vmem %s641_s29, 32  ;;  %p1011_p9 = scmp.lt.s32.totalorder %s641_s29, %s641_s29 }
 0x2d6   :  { %p1007_p8 = scmp.ne.s32.totalorder %s641_s29, %s1006_s30  ;;  %p1012_p10 = scmp.lt.s32.totalorder %s1006_s30, %s1006_s30 }
 0x2d8   :  { %p1013_p11 = por %p1012_p10, %p1011_p9 }
 0x2da   :  { %p1014_p12 = pnand %p1013_p11, %p1007_p8 }
 0x2e9   :  { %v629_v45 = vpop.f32.mrb[2].mxu1 }
 0x2ea   :  { %v630_v46 = vadd.f32 %v709_v38, %v629_v45  ;;  %v892_v47 = vpop.f32.mrb[3].mxu1 }
 0x2ec   :  { %633 = vst [vmem:[#allocation2] sm:$0x3] %v630_v46 }
 0x2ed   :  { %1017 = shalt.err (!%p1014_p12)
}
 0x2ee   :  { %s1018_s10 = scalar_lea.hbm %s1329_s7, 32 }
 0x2ef   :  { %p1019_p13 = scmp.ne.s32.totalorder %s1329_s7, %s1018_s10  ;;  %p1022_p0 = scmp.lt.u32.totalorder %s1018_s10, %s1329_s7 }
 0x2f1   :  { %p1024_p1 = pnand %p1022_p0, %p1019_p13 }
 0x2f3   :  { %1027 = shalt.err (!%p1024_p1)
}
 0x2f4   :  { %643 = dma.vmem_to_hbm [thread:$0]  %s641_s29, 32, %s1329_s7, [#allocation3]  }
 0x2f5   :  { %1028 = dma.done.wait [#allocation3], 32  }
 0x2f6   :  { %1029 = vsyncadd [#allocation3], 4294967264 }
 0x2f7   :  { %1030 = dma.done.wait [#allocation5], 32  }
 0x2f8   :  { %1031 = vsyncadd [#allocation5], 4294967264 }
 0x2f9   :  { %660 = vsyncpa [#allocation3], 1 }
 0x2fa   :  { %661 = vsyncpa [#allocation5], 1 }

</bundles_post_ra>
